<compile_context>
chip_gen: v5e
topology: v5e:2x2
jax: 0.10.0
libtpu: 0.0.40
codegen_flags: <defaults>
</compile_context>

<pallas_src>
import functools

import jax
import jax.numpy as jnp
from jax import lax
from jax.experimental import pallas as pl
from jax.experimental.pallas import tpu as pltpu


# ------------------------------ helpers ----------------------------------
def _tpu_generation():
    """Best-effort TPU generation (5 / 6 / 7); defaults to 6."""
    try:
        kind = jax.devices()[0].device_kind.lower()
    except Exception:
        return 6
    for gen in (7, 6, 5):
        if "v%d" % gen in kind:
            return gen
    return 6


def _pick_tile(dim, prefs, granule=8):
    """Largest preferred tile dividing `dim`; else largest granule-multiple
    divisor <= max(prefs); else the full dim (legal per the (8,128) rule
    because it then equals the array extent)."""
    for p in prefs:
        if dim >= p and dim % p == 0:
            return p
    cap = min(max(prefs), dim)
    t = (cap // granule) * granule
    while t >= granule:
        if dim % t == 0:
            return t
        t -= granule
    # TODO(synk): pad or use pl.BoundedSlice for ragged tails instead of a
    # full-extent fallback block (can exceed VMEM for large awkward dims).
    return dim


def _compiler_params(dimension_semantics, est_vmem_bytes):
    kwargs = dict(dimension_semantics=dimension_semantics)
    # Default scoped VMEM is ~32 MiB; raise only when the tiling needs it and
    # stay <= 48 MiB so it also fits v7x's 64 MiB physical VMEM per TC.
    if est_vmem_bytes > 24 * 1024 * 1024:
        kwargs["vmem_limit_bytes"] = min(2 * est_vmem_bytes, 48 * 1024 * 1024)
    return pltpu.CompilerParams(**kwargs)


# ----------------------------- Linear kernels -----------------------------
_RESIDENT_WEIGHT_BYTES = 12 * 1024 * 1024  # keep resident weights v7x-safe


def _linear_resident_kernel(x_ref, w_ref, b_ref, o_ref):
    acc = jnp.dot(x_ref[...], w_ref[...], preferred_element_type=jnp.float32)
    o_ref[...] = (acc + b_ref[...]).astype(o_ref.dtype)


def pallas_linear_resident(x, w_t, b_row, out_dtype):
    """Weight stays VMEM-resident (DMA'd once); grid only over M tiles."""
    m, d_in = x.shape
    d_out = w_t.shape[1]
    tm = _pick_tile(m, (1024, 512, 256, 128, 64, 32, 16, 8), granule=8)
    grid = (m // tm,)

    in_bytes = x.dtype.itemsize
    out_bytes = jnp.dtype(out_dtype).itemsize
    cost = pl.CostEstimate(
        flops=2 * m * d_in * d_out,
        transcendentals=0,
        bytes_accessed=(m * d_in + d_in * d_out) * in_bytes
        + m * d_out * out_bytes + d_out * 4,
    )
    est_vmem = (2 * tm * d_in * in_bytes + d_in * d_out * in_bytes
                + 2 * tm * d_out * out_bytes + d_out * 4)

    return pl.pallas_call(
        _linear_resident_kernel,
        out_shape=jax.ShapeDtypeStruct((m, d_out), out_dtype),
        grid_spec=pltpu.PrefetchScalarGridSpec(
            num_scalar_prefetch=0,
            grid=grid,
            in_specs=[
                pl.BlockSpec((tm, d_in), lambda i: (i, 0)),
                pl.BlockSpec((d_in, d_out), lambda i: (0, 0)),
                pl.BlockSpec((1, d_out), lambda i: (0, 0)),
            ],
            out_specs=pl.BlockSpec((tm, d_out), lambda i: (i, 0)),
        ),
        compiler_params=_compiler_params(("parallel",), est_vmem),
        cost_estimate=cost,
    )(x, w_t, b_row)


def _linear_tiled_kernel(x_ref, w_ref, b_ref, o_ref, acc_ref):
    k = pl.program_id(2)

    @pl.when(k == 0)
    def _init():
        acc_ref[...] = jnp.zeros_like(acc_ref)

    acc_ref[...] += jnp.dot(x_ref[...], w_ref[...],
                            preferred_element_type=jnp.float32)

    @pl.when(k == pl.num_programs(2) - 1)
    def _flush():
        o_ref[...] = (acc_ref[...] + b_ref[...]).astype(o_ref.dtype)


def pallas_linear_tiled(x, w_t, b_row, out_dtype):
    """M/N/K-tiled matmul with f32 VMEM accumulator (for large weights)."""
    m, d_in = x.shape
    d_out = w_t.shape[1]
    tm = _pick_tile(m, (1024, 512, 256, 128, 64, 32, 16, 8), granule=8)
    tn = _pick_tile(d_out, (512, 256, 128), granule=128)
    tk = _pick_tile(d_in, (512, 256, 128), granule=128)
    grid = (m // tm, d_out // tn, d_in // tk)

    in_bytes = x.dtype.itemsize
    out_bytes = jnp.dtype(out_dtype).itemsize
    cost = pl.CostEstimate(
        flops=2 * m * d_in * d_out,
        transcendentals=0,
        bytes_accessed=(m * d_in + (m // tm) * d_in * d_out) * in_bytes
        + m * d_out * out_bytes + d_out * 4,
    )
    est_vmem = (2 * (tm * tk + tk * tn + tn) * in_bytes
                + 2 * tm * tn * out_bytes + tm * tn * 4)

    return pl.pallas_call(
        _linear_tiled_kernel,
        out_shape=jax.ShapeDtypeStruct((m, d_out), out_dtype),
        grid_spec=pltpu.PrefetchScalarGridSpec(
            num_scalar_prefetch=0,
            grid=grid,
            in_specs=[
                pl.BlockSpec((tm, tk), lambda i, j, k: (i, k)),
                pl.BlockSpec((tk, tn), lambda i, j, k: (k, j)),
                pl.BlockSpec((1, tn), lambda i, j, k: (0, j)),
            ],
            out_specs=pl.BlockSpec((tm, tn), lambda i, j, k: (i, j)),
            scratch_shapes=[pltpu.VMEM((tm, tn), jnp.float32)],
        ),
        compiler_params=_compiler_params(
            ("parallel", "parallel", "arbitrary"), est_vmem),
        cost_estimate=cost,
    )(x, w_t, b_row)


def pallas_linear(x, w_t, b_row, out_dtype):
    """x: (M, d_in); w_t: (d_in, d_out) pre-transposed; b_row: (1, d_out) f32."""
    d_in, d_out = w_t.shape
    if d_in * d_out * w_t.dtype.itemsize <= _RESIDENT_WEIGHT_BYTES:
        return pallas_linear_resident(x, w_t, b_row, out_dtype)
    return pallas_linear_tiled(x, w_t, b_row, out_dtype)


# ------------------------- Flash attention kernel -------------------------
def _flash_attn_kernel(q_ref, k_ref, v_ref, o_ref, m_ref, l_ref, acc_ref,
                       *, nhead, head_dim, compute_dtype, approx_recip):
    kv_idx = pl.program_id(2)

    @pl.when(kv_idx == 0)
    def _init():
        m_ref[...] = jnp.full_like(m_ref, -jnp.inf)
        l_ref[...] = jnp.zeros_like(l_ref)
        acc_ref[...] = jnp.zeros_like(acc_ref)

    # q is already scaled (scale folded into W_q / b_q at __init__).
    q = q_ref[0]                            # (tq, D)
    k = k_ref[0]                            # (tkv, D)
    v = v_ref[0]                            # (tkv, D)

    # TODO(synk): switch to lax.fori_loop over heads (pl.ds head slices, dynamic
    # m/l/acc indexing) if nhead >= 8 and the bundle dump shows vreg spills.
    for h in range(nhead):
        lo = h * head_dim
        hi = lo + head_dim
        # Scores: contract on head_dim directly (no in-kernel K transpose).
        s = lax.dot_general(q[:, lo:hi], k[:, lo:hi],
                            (((1,), (1,)), ((), ())),
                            preferred_element_type=jnp.float32)   # (tq, tkv)

        m_prev = m_ref[h]                                          # (tq, 1)
        m_new = jnp.maximum(m_prev, jnp.max(s, axis=-1, keepdims=True))
        alpha = jnp.exp(m_prev - m_new)                            # f32 epilogue
        p = jnp.exp(s - m_new)                                     # (tq, tkv)
        l_ref[h] = alpha * l_ref[h] + jnp.sum(p, axis=-1, keepdims=True)
        pv = jnp.dot(p.astype(compute_dtype), v[:, lo:hi],
                     preferred_element_type=jnp.float32)           # (tq, hd)
        acc_ref[h] = alpha * acc_ref[h] + pv
        m_ref[h] = m_new

    @pl.when(kv_idx == pl.num_programs(2) - 1)
    def _finalize():
        if head_dim % 128 == 0:
            # Lane-aligned heads: store each normalized head directly.
            for h in range(nhead):
                lo = h * head_dim
                o_ref[0, :, lo:lo + head_dim] = (
                    acc_ref[h] * pl.reciprocal(l_ref[h], approx=approx_recip)
                ).astype(o_ref.dtype)
        else:
            outs = [acc_ref[h] * pl.reciprocal(l_ref[h], approx=approx_recip)
                    for h in range(nhead)]
            o_ref[0] = jnp.concatenate(outs, axis=-1).astype(o_ref.dtype)


def _attn_tile_prefs():
    gen = _tpu_generation()
    if gen >= 6:
        # 256-wide MXU: bigger tq/tkv amortizes weight-push + grid-step overhead.
        return (512, 256, 128, 64, 32, 16, 8), (512, 256, 128, 64, 32, 16, 8)
    # v5e: 128-wide MXU, single vst slot -> keep tiles at 128-256.
    return (256, 128, 64, 32, 16, 8), (256, 128, 64, 32, 16, 8)


def _flash_attention_call(operands, in_specs, B, T, D, tq, tkv, nhead,
                          compute_dtype):
    head_dim = D // nhead
    itemsize = jnp.dtype(compute_dtype).itemsize
    approx_recip = jnp.dtype(compute_dtype) != jnp.dtype(jnp.float32)

    kern = functools.partial(_flash_attn_kernel, nhead=nhead, head_dim=head_dim,
                             compute_dtype=compute_dtype,
                             approx_recip=approx_recip)

    kv_passes = T // tq  # K/V are re-streamed once per q tile
    cost = pl.CostEstimate(
        flops=4 * B * T * T * D,                 # QK^T and PV matmuls
        transcendentals=B * nhead * T * T,       # softmax exp
        bytes_accessed=(B * T * D * itemsize                    # Q (read once)
                        + 2 * B * kv_passes * T * D * itemsize  # K, V re-reads
                        + B * T * D * itemsize),                # output
    )
    est_vmem = (2 * (tq + 2 * tkv) * D * itemsize   # double-buffered q/k/v
                + 2 * tq * D * itemsize             # double-buffered output
                + nhead * tq * (head_dim + 2) * 4   # m/l/acc scratch
                + 2 * tq * tkv * 4)                 # live f32 s/p temporaries

    out_spec = pl.BlockSpec((1, tq, D), lambda b, i, j: (b, i, 0))
    return pl.pallas_call(
        kern,
        out_shape=jax.ShapeDtypeStruct((B, T, D), compute_dtype),
        grid_spec=pltpu.PrefetchScalarGridSpec(
            num_scalar_prefetch=0,
            grid=(B, T // tq, T // tkv),
            in_specs=in_specs,
            out_specs=out_spec,
            scratch_shapes=[
                pltpu.VMEM((nhead, tq, 1), jnp.float32),         # running max
                pltpu.VMEM((nhead, tq, 1), jnp.float32),         # running denom
                pltpu.VMEM((nhead, tq, head_dim), jnp.float32),  # output acc
            ],
        ),
        compiler_params=_compiler_params(
            ("parallel", "parallel", "arbitrary"), est_vmem),
        cost_estimate=cost,
    )(*operands)


def pallas_flash_attention(q, k, v, nhead, compute_dtype):
    """q, k, v: (B, T, D) with D = nhead * head_dim -> (B, T, D)."""
    B, T, D = q.shape
    tq_prefs, tkv_prefs = _attn_tile_prefs()
    tq = _pick_tile(T, tq_prefs)
    tkv = _pick_tile(T, tkv_prefs)
    q_spec = pl.BlockSpec((1, tq, D), lambda b, i, j: (b, i, 0))
    kv_spec = pl.BlockSpec((1, tkv, D), lambda b, i, j: (b, j, 0))
    # TODO(synk): on v5e sweep pipeline_mode=pl.Buffered(3) on the k/v specs.
    return _flash_attention_call((q, k, v), [q_spec, kv_spec, kv_spec],
                                 B, T, D, tq, tkv, nhead, compute_dtype)


def pallas_flash_attention_fused_qkv(qkv, d_model, nhead, compute_dtype):
    """qkv: (B, T, 3*d_model) fused projection output; requires d_model % 128 == 0.

    The three BlockSpecs window the SAME HBM operand at D-offsets 0 / D / 2D
    (block index in the last dim), so no wrapper-side slicing copies occur."""
    B, T, D3 = qkv.shape
    D = d_model
    assert D3 == 3 * D and D % 128 == 0
    tq_prefs, tkv_prefs = _attn_tile_prefs()
    tq = _pick_tile(T, tq_prefs)
    tkv = _pick_tile(T, tkv_prefs)
    q_spec = pl.BlockSpec((1, tq, D), lambda b, i, j: (b, i, 0))
    k_spec = pl.BlockSpec((1, tkv, D), lambda b, i, j: (b, j, 1))
    v_spec = pl.BlockSpec((1, tkv, D), lambda b, i, j: (b, j, 2))
    return _flash_attention_call((qkv, qkv, qkv), [q_spec, k_spec, v_spec],
                                 B, T, D, tq, tkv, nhead, compute_dtype)


# ------------------------------ Full module ------------------------------
class CustomMultiHeadAttentionPallas:
    """Eval-mode CustomMultiHeadAttention (dropout = identity, no masks)."""

    def __init__(self, d_model, nhead, key, compute_dtype=jnp.bfloat16):
        assert d_model % nhead == 0
        self.d_model = d_model
        self.nhead = nhead
        self.head_dim = d_model // nhead
        self.scale = self.head_dim ** (-0.5)
        self.compute_dtype = compute_dtype

        ks = jax.random.split(key, 8)
        bound = 1.0 / (d_model ** 0.5)  # matches nn.Linear default init range
        init_w = lambda kk: jax.random.uniform(
            kk, (d_model, d_model), jnp.float32, -bound, bound)
        init_b = lambda kk: jax.random.uniform(
            kk, (d_model,), jnp.float32, -bound, bound)

        # f32 master parameters (PyTorch (out, in) convention) for reference use.
        self.Wq, self.bq = init_w(ks[0]), init_b(ks[1])
        self.Wk, self.bk = init_w(ks[2]), init_b(ks[3])
        self.Wv, self.bv = init_w(ks[4]), init_b(ks[5])
        self.Wo, self.bo = init_w(ks[6]), init_b(ks[7])

        # Kernel-side parameters: transposed once, QKV fused, the softmax scale
        # folded into W_q / b_q, biases kept f32 (added to f32 accumulator),
        # weights pre-cast to the MXU compute dtype.
        cd = compute_dtype
        wq_t_scaled = self.Wq.T * self.scale
        bq_scaled = self.bq * self.scale
        self.Wq_t = wq_t_scaled.astype(cd)
        self.Wk_t = self.Wk.T.astype(cd)
        self.Wv_t = self.Wv.T.astype(cd)
        self.Wo_t = self.Wo.T.astype(cd)
        self.Wqkv_t = jnp.concatenate(
            [wq_t_scaled, self.Wk.T, self.Wv.T], axis=1).astype(cd)
        self.bq_row = bq_scaled.reshape(1, -1)
        self.bk_row = self.bk.reshape(1, -1)
        self.bv_row = self.bv.reshape(1, -1)
        self.bo_row = self.bo.reshape(1, -1)
        self.bqkv_row = jnp.concatenate(
            [bq_scaled, self.bk, self.bv]).reshape(1, -1)

    def __call__(self, query, key, value):
        B, T, D = query.shape
        cd = self.compute_dtype

        # NOTE: the fused fast path keys on Python object identity; under jit
        # with equal-but-distinct arrays it takes the (equally correct)
        # 3-projection path.
        self_attn = (key is query) and (value is query)

        if self_attn and D % 128 == 0:
            # Fused QKV projection (one activation read, 3x MXU N dimension),
            # then zero-copy fused-QKV attention (no wrapper slicing).
            x = query.reshape(B * T, D).astype(cd)
            qkv = pallas_linear(x, self.Wqkv_t, self.bqkv_row, cd)  # (B*T, 3D)
            Oh = pallas_flash_attention_fused_qkv(
                qkv.reshape(B, T, 3 * D), D, self.nhead, cd)
        else:
            # Cross-attention or non-lane-aligned d_model: three projections,
            # no slicing anywhere.
            Qf = pallas_linear(query.reshape(B * T, D).astype(cd),
                               self.Wq_t, self.bq_row, cd)
            Kf = pallas_linear(key.reshape(B * T, D).astype(cd),
                               self.Wk_t, self.bk_row, cd)
            Vf = pallas_linear(value.reshape(B * T, D).astype(cd),
                               self.Wv_t, self.bv_row, cd)
            Oh = pallas_flash_attention(Qf.reshape(B, T, D),
                                        Kf.reshape(B, T, D),
                                        Vf.reshape(B, T, D),
                                        self.nhead, cd)

        out = pallas_linear(Oh.reshape(B * T, D), self.Wo_t, self.bo_row,
                            jnp.float32)
        return out.reshape(B, T, D)


# ----------------------------- Reference (JAX) ----------------------------
def reference_mha(mod, query, key, value):
    hp = jax.lax.Precision.HIGHEST
    B, T, D = query.shape
    H, hd = mod.nhead, mod.head_dim
    Q = jnp.dot(query, mod.Wq.T, precision=hp) + mod.bq
    K = jnp.dot(key, mod.Wk.T, precision=hp) + mod.bk
    V = jnp.dot(value, mod.Wv.T, precision=hp) + mod.bv
    Q = Q.reshape(B, T, H, hd).transpose(0, 2, 1, 3)
    K = K.reshape(B, T, H, hd).transpose(0, 2, 1, 3)
    V = V.reshape(B, T, H, hd).transpose(0, 2, 1, 3)
    s = jnp.einsum("bhqd,bhkd->bhqk", Q, K, precision=hp) * mod.scale
    p = jax.nn.softmax(s, axis=-1)
    o = jnp.einsum("bhqk,bhkd->bhqd", p, V, precision=hp)
    o = o.transpose(0, 2, 1, 3).reshape(B, T, D)
    return jnp.dot(o, mod.Wo.T, precision=hp) + mod.bo


if __name__ == "__main__":
    key = jax.random.PRNGKey(0)
    k_q, k_k, k_v, k_params, k_params2, k_x, k_w, k_b = jax.random.split(key, 8)

    # --- lane-aligned config: exercises fused-QKV projection + fused attention.
    B, T, d_model, nhead = 2, 8, 128, 4
    query = jax.random.normal(k_q, (B, T, d_model), jnp.float32)
    key_in = jax.random.normal(k_k, (B, T, d_model), jnp.float32)
    value = jax.random.normal(k_v, (B, T, d_model), jnp.float32)

    mod_f32 = CustomMultiHeadAttentionPallas(d_model, nhead, k_params,
                                             compute_dtype=jnp.float32)
    ref_cross = reference_mha(mod_f32, query, key_in, value)
    out_cross = jax.block_until_ready(mod_f32(query, key_in, value))
    assert out_cross.shape == (B, T, d_model)
    assert jnp.allclose(out_cross, ref_cross, atol=5e-3, rtol=5e-3), \
        "f32 cross-attn mismatch"

    ref_self = reference_mha(mod_f32, query, query, query)
    out_self = jax.block_until_ready(mod_f32(query, query, query))
    assert jnp.allclose(out_self, ref_self, atol=5e-3, rtol=5e-3), \
        "fused QKV self-attn mismatch"

    # --- bf16 MXU inputs / f32 accumulation (default compute_dtype). ---
    mod_bf16 = CustomMultiHeadAttentionPallas(d_model, nhead, k_params)
    out_bf16 = jax.block_until_ready(mod_bf16(query, query, query))
    assert jnp.allclose(out_bf16, ref_self, atol=1e-1, rtol=1e-1), \
        "bf16 path mismatch"

    # --- small, non-lane-aligned d_model: 3-projection fallback path. ---
    B2, T2, d2, h2 = 2, 8, 32, 4
    q2 = jax.random.normal(k_q, (B2, T2, d2), jnp.float32)
    mod_small = CustomMultiHeadAttentionPallas(d2, h2, k_params2,
                                               compute_dtype=jnp.float32)
    ref_small = reference_mha(mod_small, q2, q2, q2)
    out_small = jax.block_until_ready(mod_small(q2, q2, q2))
    assert jnp.allclose(out_small, ref_small, atol=5e-3, rtol=5e-3), \
        "small-d_model fallback mismatch"

    # --- sanity-check the M/N/K-tiled linear (path used for large weights). ---
    xt = jax.random.normal(k_x, (64, 1024), jnp.float32)
    wt = jax.random.normal(k_w, (1024, 256), jnp.float32) * 0.03
    bt = jax.random.normal(k_b, (256,), jnp.float32)
    yt = jax.block_until_ready(
        pallas_linear_tiled(xt, wt, bt.reshape(1, -1), jnp.float32))
    yt_ref = jnp.dot(xt, wt, precision=jax.lax.Precision.HIGHEST) + bt
    assert jnp.allclose(yt, yt_ref, atol=5e-3, rtol=5e-3), "tiled linear mismatch"

    print("KERNEL_OK")
</pallas_src>

<mosaic_0001>
module attributes {stable_mosaic.version = 11 : i64} {
  func.func @_linear_resident_kernel(%arg0: i32, %arg1: memref<16x128xf32, #tpu.memory_space<vmem>>, %arg2: memref<128x128xf32, #tpu.memory_space<vmem>>, %arg3: memref<1x128xf32, #tpu.memory_space<vmem>>, %arg4: memref<16x128xf32, #tpu.memory_space<vmem>>) attributes {dimension_semantics = [#tpu.dimension_semantics<parallel>], iteration_bounds = array<i64: 1>, scalar_prefetch = 0 : i64, scratch_operands = 0 : i64, tpu.core_type = #tpu.core_type<tc>, window_params = [{transform_indices = @transform_0, window_bounds = array<i64: 16, 128>}, {pipeline_mode = #tpu.pipeline_mode<synchronous>, transform_indices = @transform_1, window_bounds = array<i64: 128, 128>}, {pipeline_mode = #tpu.pipeline_mode<synchronous>, transform_indices = @transform_2, window_bounds = array<i64: 1, 128>}, {transform_indices = @transform_3, window_bounds = array<i64: 16, 128>}]} {
    %c0 = arith.constant 0 : index
    %c0_0 = arith.constant 0 : index
    %0 = vector.load %arg1[%c0, %c0_0] : memref<16x128xf32, #tpu.memory_space<vmem>>, vector<16x128xf32>
    %c0_1 = arith.constant 0 : index
    %c0_2 = arith.constant 0 : index
    %1 = vector.load %arg2[%c0_1, %c0_2] : memref<128x128xf32, #tpu.memory_space<vmem>>, vector<128x128xf32>
    %cst = arith.constant dense<0.000000e+00> : vector<16x128xf32>
    %2 = tpu.matmul %0, %1, %cst {dimension_numbers = #tpu.dot_dimension_numbers<[1], [0], [0], [1], [0, 0, 1, 1], [], []>} : vector<16x128xf32>, vector<128x128xf32>, vector<16x128xf32> -> vector<16x128xf32>
    %c0_3 = arith.constant 0 : index
    %c0_4 = arith.constant 0 : index
    %3 = vector.load %arg3[%c0_3, %c0_4] : memref<1x128xf32, #tpu.memory_space<vmem>>, vector<1x128xf32>
    %4 = vector.broadcast %3 : vector<1x128xf32> to vector<16x128xf32>
    %5 = arith.addf %2, %4 : vector<16x128xf32>
    %c0_5 = arith.constant 0 : index
    %c0_6 = arith.constant 0 : index
    %6 = vector.load %arg4[%c0_5, %c0_6] : memref<16x128xf32, #tpu.memory_space<vmem>>, vector<16x128xf32>
    tpu.vector_store %arg4[%c0_5, %c0_6], %5 {strides = array<i32>} : memref<16x128xf32, #tpu.memory_space<vmem>>, vector<16x128xf32>,
    return
  }
  func.func @transform_0(%arg0: i32) -> (i32, i32) {
    %c0_i32 = arith.constant 0 : i32
    %c0_i32_0 = arith.constant 0 : i32
    return %arg0, %c0_i32 : i32, i32
  }
  func.func @transform_1(%arg0: i32) -> (i32, i32) {
    %c0_i32 = arith.constant 0 : i32
    %c0_i32_0 = arith.constant 0 : i32
    %c0_i32_1 = arith.constant 0 : i32
    return %c0_i32, %c0_i32_0 : i32, i32
  }
  func.func @transform_2(%arg0: i32) -> (i32, i32) {
    %c0_i32 = arith.constant 0 : i32
    %c0_i32_0 = arith.constant 0 : i32
    %c0_i32_1 = arith.constant 0 : i32
    return %c0_i32, %c0_i32_0 : i32, i32
  }
  func.func @transform_3(%arg0: i32) -> (i32, i32) {
    %c0_i32 = arith.constant 0 : i32
    %c0_i32_0 = arith.constant 0 : i32
    return %arg0, %c0_i32 : i32, i32
  }
}

</mosaic_0001>

<bundles_post_ra>
// kernel: tpu_custom_call.1
= control target key start
LH: loop header
LB: loop body
LE: loop exit
PB: predicated region body
PF: predicated region fallthrough
CT: control target
= control target key end

     0   :  { %8 = vsyncpa [#allocation3], 0  ;;  %s260_s0 = inlined_call_operand.hbm [shape: f32[16,128], index: 0, kind: input, shape index: {}]   ;;  %s261_s1 = inlined_call_operand.hbm [shape: f32[128,128], index: 1, kind: input, shape index: {}]   ;;  %s262_s2 = inlined_call_operand.vmem [shape: f32[1,128], index: 2, kind: input, shape index: {}]   ;;  %s263_s3 = inlined_call_operand.hbm [shape: f32[16,128], index: 3, kind: output, shape index: {}]  }
   0x1   :  { %9 = vsyncpa [#allocation6], 0 }
   0x2   :  { %10 = vsyncpa [#allocation4], 0  ;;  %s15_s14 = sshll.u32 %s260_s0, 4  ;;  %s214_s15 = smov [#allocation2]   ;;  %s16_s14 = int_to_ptr.hbm [resolvable:$true] %s15_s14 }
   0x3   :  { %s17_s16 = sshll.u32 %s214_s15, 4  ;;  %s28_s19 = sshll.u32 %s261_s1, 4  ;;  %s18_s16 = int_to_ptr.vmem [resolvable:$true] %s17_s16  ;;  %s29_s19 = int_to_ptr.hbm [resolvable:$true] %s28_s19 }
   0x4   :  { %s215_s20 = smov 128   ;;  %s216_s21 = smov 8  }
   0x5   :  { %23 = dma.hbm_to_vmem [thread:$0]  %s16_s14, 256, %s18_s16, [#allocation3], %s215_s20, %s215_s20, %s216_s21  }
   0x6   :  { %s217_s22 = smov [#allocation5]  }
   0x7   :  { %s30_s23 = sshll.u32 %s217_s22, 4  ;;  %s31_s23 = int_to_ptr.vmem [resolvable:$true] %s30_s23 }
   0x8   :  { %36 = dma.hbm_to_vmem [thread:$0]  %s29_s19, 2048, %s31_s23, [#allocation6], %s215_s20, %s215_s20, %s216_s21  }
   0x9   :  { %208 = dma.done.wait [#allocation3], 256  }
   0xa   :  { %209 = vsyncadd [#allocation3], 4294967040 }
   0xb   :  { %210 = dma.done.wait [#allocation6], 2048  }
   0xc   :  { %211 = vsyncadd [#allocation6], 4294965248  ;;  %v64_v0 = vld [vmem:[#allocation5 + $0x78] sm:$0xff]  ;;  %v63_v1 = vld [vmem:[#allocation5 + $0x70] sm:$0xff]  ;;  %s218_s24 = smov [#allocation7]   ;;  %s100_s28 = sshll.u32 %s263_s3, 4  ;;  %s101_s28 = int_to_ptr.hbm [resolvable:$true] %s100_s28 }
   0xd   :  { %69 = vmatpush.msra.mxu0 %v64_v0  ;;  %114 = vmatpush.msra.mxu1 %v64_v0  ;;  %v62_v2 = vld [vmem:[#allocation5 + $0x68] sm:$0xff]  ;;  %v61_v3 = vld [vmem:[#allocation5 + $0x60] sm:$0xff]  ;;  %v60_v4 = vld [vmem:[#allocation5 + $0x58] sm:$0xff]  ;;  %s98_s25 = sshll.u32 %s218_s24, 4  ;;  %s99_s25 = int_to_ptr.vmem [resolvable:$true] %s98_s25 }
   0xe   :  { %v59_v5 = vld [vmem:[#allocation5 + $0x50] sm:$0xff]  ;;  %v58_v6 = vld [vmem:[#allocation5 + $0x48] sm:$0xff]  ;;  %v57_v7 = vld [vmem:[#allocation5 + $0x40] sm:$0xff] }
   0xf   :  { %70 = vmatpush.msra.mxu0 %v63_v1  ;;  %115 = vmatpush.msra.mxu1 %v63_v1  ;;  %v56_v8 = vld [vmem:[#allocation5 + $0x38] sm:$0xff]  ;;  %v55_v9 = vld [vmem:[#allocation5 + $0x30] sm:$0xff]  ;;  %v54_v10 = vld [vmem:[#allocation5 + $0x28] sm:$0xff] }
  0x10   :  { %v53_v11 = vld [vmem:[#allocation5 + $0x20] sm:$0xff]  ;;  %v52_v12 = vld [vmem:[#allocation5 + $0x18] sm:$0xff]  ;;  %v51_v13 = vld [vmem:[#allocation5 + $0x10] sm:$0xff] }
  0x11   :  { %71 = vmatpush.msra.mxu0 %v62_v2  ;;  %116 = vmatpush.msra.mxu1 %v62_v2  ;;  %v50_v14 = vld [vmem:[#allocation5 + $0x8] sm:$0xff]  ;;  %v49_v15 = vld [vmem:[#allocation5] sm:$0xff]  ;;  %v47_v16 = vld [vmem:[#allocation2] sm:$0xff] }
  0x12   :  { %v48_v17 = vld [vmem:[#allocation2 + $0x8] sm:$0xff]  ;;  %v135_v18 = vld [vmem:[%s262_s2] ss:$0 sm:$0xff] }
  0x13   :  { %72 = vmatpush.msra.mxu0 %v61_v3  ;;  %117 = vmatpush.msra.mxu1 %v61_v3 }
  0x15   :  { %73 = vmatpush.msra.mxu0 %v60_v4  ;;  %118 = vmatpush.msra.mxu1 %v60_v4 }
  0x17   :  { %74 = vmatpush.msra.mxu0 %v59_v5  ;;  %119 = vmatpush.msra.mxu1 %v59_v5 }
  0x19   :  { %75 = vmatpush.msra.mxu0 %v58_v6  ;;  %120 = vmatpush.msra.mxu1 %v58_v6 }
  0x1b   :  { %76 = vmatpush.msra.mxu0 %v57_v7  ;;  %121 = vmatpush.msra.mxu1 %v57_v7 }
  0x1d   :  { %77 = vmatpush.msra.mxu0 %v56_v8  ;;  %122 = vmatpush.msra.mxu1 %v56_v8 }
  0x1f   :  { %78 = vmatpush.msra.mxu0 %v55_v9  ;;  %123 = vmatpush.msra.mxu1 %v55_v9 }
  0x21   :  { %79 = vmatpush.msra.mxu0 %v54_v10  ;;  %124 = vmatpush.msra.mxu1 %v54_v10 }
  0x23   :  { %80 = vmatpush.msra.mxu0 %v53_v11  ;;  %125 = vmatpush.msra.mxu1 %v53_v11 }
  0x25   :  { %81 = vmatpush.msra.mxu0 %v52_v12  ;;  %126 = vmatpush.msra.mxu1 %v52_v12 }
  0x27   :  { %82 = vmatpush.msra.mxu0 %v51_v13  ;;  %127 = vmatpush.msra.mxu1 %v51_v13 }
  0x29   :  { %83 = vmatpush.msra.mxu0 %v50_v14  ;;  %128 = vmatpush.msra.mxu1 %v50_v14 }
  0x2b   :  { %84 = vmatpush.msra.mxu0 %v49_v15  ;;  %129 = vmatpush.msra.mxu1 %v49_v15 }
  0x2c   :  { %85 = vmatmul.f32.vlgmr.msra.gmra.mxu0 %v47_v16  ;;  %88 = vmatmul.f32.vlgmr.msra.gmra.mxu1 %v48_v17 }
  0xa9   :  { %v86_v19 = vpop.f32.mrf.mxu0  ;;  %v89_v20 = vpop.f32.mrf.mxu1 }
  0xaa   :  { %v87_v21 = vadd.f32 %v135_v18, %v86_v19  ;;  %v90_v22 = vadd.f32 %v135_v18, %v89_v20 }
  0xac   :  { %92 = vst [vmem:[#allocation7] sm:$0xff] %v87_v21 }
  0xad   :  { %93 = vst [vmem:[#allocation7 + $0x8] sm:$0xff] %v90_v22 }
  0xae   :  { %106 = dma.vmem_to_hbm [thread:$0]  %s99_s25, 256, %s101_s28, [#allocation4], %s215_s20, %s215_s20, %s216_s21  }
  0xaf   :  { %212 = dma.done.wait [#allocation4], 256  }
  0xb0   :  { %213 = vsyncadd [#allocation4], 4294967040 }
  0xb1   :  { %111 = vsyncpa [#allocation3], 1 }
  0xb2   :  { %112 = vsyncpa [#allocation6], 1 }
  0xb3   :  { %113 = vsyncpa [#allocation4], 1 }

</bundles_post_ra>
